<compile_context>
chip_gen: v7x
topology: tpu7x:2x2x1
jax: 0.10.0
libtpu: 0.0.40
codegen_flags: <defaults>
</compile_context>

<pallas_src>
import functools

import jax
import jax.numpy as jnp
from jax.experimental import pallas as pl
from jax.experimental.pallas import tpu as pltpu


def _mlp_kernel(*refs, num_layers: int, compute_dtype, out_pack: int):
    """Fused MLP on one batch tile: h = x; per layer h = h @ W + b (+ ReLU)."""
    x_ref = refs[0]
    o_ref = refs[-1]
    param_refs = refs[1:-1]  # flattened (w0, b0, w1, b1, ...)

    h = x_ref[...]
    for i in range(num_layers):
        w = param_refs[2 * i][...]
        b = param_refs[2 * i + 1][...]
        # Cast the activation tile to the MXU operand dtype *inside* the kernel
        # (hidden under DMA); weights were already pre-cast once in the wrapper.
        lhs = h.astype(compute_dtype) if compute_dtype is not None else h
        y = jnp.dot(lhs, w, preferred_element_type=jnp.float32)
        y = y + b.astype(jnp.float32)  # (1, Dout) broadcasts over the batch tile
        if i != num_layers - 1:
            y = jnp.maximum(y, 0.0)  # ReLU between all but the last layer
        h = y

    if out_pack > 1:
        # Lane-dense relayout: (tm, Dout) -> (tm // pack, Dout * pack): pack
        # `pack` consecutive batch rows into the 128 lanes of one output row
        # (same row-major bytes; the wrapper reshape back is free).
        tm, dout = h.shape
        h = h.reshape(tm // out_pack, dout * out_pack)
    o_ref[...] = h.astype(o_ref.dtype)


def mlp_forward(params, x, *, block_batch: int = 2048, use_bf16: bool = False,
                lane_dense=None, v7x_core_parallel: bool = False):
    """Fused Pallas MLP forward.

    params: list of (w, b) with w: [Din, Dout], b: [1, Dout].
    x:      [B, Din]
    """
    B, Din = x.shape
    Dout = params[-1][0].shape[1]
    num_layers = len(params)
    out_dtype = x.dtype

    # Batch tile: full batch if it fits one block, otherwise a multiple of 8
    # (sublane constraint) up to `block_batch`.
    if B <= block_batch:
        tm = B
    else:
        tm = max(8, (block_batch // 8) * 8)
    nb = pl.cdiv(B, tm)

    # Optional bf16 MXU operands (v5e/v6e/v7x): pre-cast only the tiny
    # VMEM-resident weights; x is cast per-tile inside the kernel.
    compute_dtype = None
    if use_bf16:
        compute_dtype = jnp.bfloat16
        params = [(w.astype(jnp.bfloat16), b) for (w, b) in params]

    flat_params = []
    for (w, b) in params:
        flat_params.append(w)
        flat_params.append(b)

    # Lane-dense output packing: fold `pack` batch rows into 128 lanes when
    # Dout < 128.  Requires batch and tile to divide evenly and the packed
    # block to remain sublane-aligned (or single-block).
    pack = 128 // Dout if (Dout < 128 and 128 % Dout == 0) else 1
    can_pack = (
        pack > 1
        and B % pack == 0
        and tm % pack == 0
        and ((tm // pack) % 8 == 0 or tm == B)
    )
    if lane_dense is None:
        lane_dense = can_pack
    lane_dense = bool(lane_dense) and can_pack

    # Advisory cost estimate for XLA's scheduler (actual stored dtypes).
    flops = 0
    for (w, _) in params:
        flops += 2 * B * w.shape[0] * w.shape[1]
    bytes_accessed = (x.size * x.dtype.itemsize
                      + B * Dout * jnp.dtype(out_dtype).itemsize)
    for p in flat_params:
        bytes_accessed += p.size * p.dtype.itemsize

    if v7x_core_parallel:
        # TODO(synk): confirm in the trace that both v7x TensorCores receive
        # batch tiles; on single-TC v5e/v6e the plain "parallel" default is fine.
        dim_sem = (pltpu.CORE_PARALLEL,)
    else:
        dim_sem = ("parallel",)

    # x is tiled over batch; weights/biases use a constant block index so they
    # stay resident in VMEM across all grid steps (no re-DMA per tile).
    in_specs = [pl.BlockSpec((tm, Din), lambda i: (i, 0))]
    for p in flat_params:
        in_specs.append(pl.BlockSpec(p.shape, lambda i: (0, 0)))

    def _call(out_pack: int):
        if out_pack > 1:
            out_shape = jax.ShapeDtypeStruct((B // out_pack, Dout * out_pack), out_dtype)
            out_specs = pl.BlockSpec((tm // out_pack, Dout * out_pack), lambda i: (i, 0))
        else:
            out_shape = jax.ShapeDtypeStruct((B, Dout), out_dtype)
            out_specs = pl.BlockSpec((tm, Dout), lambda i: (i, 0))
        kernel = functools.partial(
            _mlp_kernel, num_layers=num_layers, compute_dtype=compute_dtype,
            out_pack=out_pack)
        return pl.pallas_call(
            kernel,
            out_shape=out_shape,
            grid=(nb,),
            in_specs=in_specs,
            out_specs=out_specs,
            compiler_params=pltpu.CompilerParams(dimension_semantics=dim_sem),
            cost_estimate=pl.CostEstimate(
                flops=flops, transcendentals=0, bytes_accessed=bytes_accessed),
        )(x, *flat_params)

    if lane_dense:
        try:
            # Row-major (B//pack, 128) -> (B, Dout) reshape is metadata-only.
            return _call(pack).reshape(B, Dout)
        except Exception:
            # TODO(synk): lane-dense (tm, Dout) -> (tm//pack, 128) in-kernel
            # relayout did not lower on this backend; fall back to the natural
            # [B, Dout] output layout (masked stores, still correct).
            pass
    return _call(1)


def init_mlp_params(key, dims):
    """Deterministic init mimicking nn.Linear.reset_parameters (uniform +-1/sqrt(fan_in))."""
    params = []
    for dim_in, dim_out in zip(dims[:-1], dims[1:]):
        key, kw, kb = jax.random.split(key, 3)
        bound = 1.0 / jnp.sqrt(jnp.float32(dim_in))
        w = jax.random.uniform(kw, (dim_in, dim_out), jnp.float32, -bound, bound)
        b = jax.random.uniform(kb, (1, dim_out), jnp.float32, -bound, bound)
        params.append((w, b))
    return params


def mlp_reference(params, x):
    """Pure-JAX reference for correctness check."""
    n = len(params)
    for i, (w, b) in enumerate(params):
        x = x @ w + b
        if i != n - 1:
            x = jnp.maximum(x, 0.0)
    return x


if __name__ == "__main__":
    key = jax.random.PRNGKey(0)
    dims = [32, 64, 16]  # MLP(dims=[32, 64, 16]) -> Linear(32,64), ReLU, Linear(64,16)

    key, kx, kp, kb = jax.random.split(key, 4)
    params = init_mlp_params(kp, dims)

    # 1) Small batch (single fused block, lane-dense (1, 128) output), f32.
    x_small = jax.random.normal(kx, (8, dims[0]), jnp.float32)
    out_small = jax.block_until_ready(mlp_forward(params, x_small))
    ref_small = mlp_reference(params, x_small)
    assert out_small.shape == (8, dims[-1])
    assert jnp.allclose(out_small, ref_small, atol=1e-4, rtol=1e-4), "f32 small-batch mismatch"

    # 2) Larger batch: exercises the batch grid (tm=256, grid=(4,)) with
    #    VMEM-resident weights, the parallel batch axis, and lane-dense output.
    x_big = jax.random.normal(kb, (1024, dims[0]), jnp.float32)
    out_big = jax.block_until_ready(mlp_forward(params, x_big, block_batch=256))
    ref_big = mlp_reference(params, x_big)
    assert out_big.shape == (1024, dims[-1])
    assert jnp.allclose(out_big, ref_big, atol=1e-4, rtol=1e-4), "f32 tiled-batch mismatch"

    # 3) bf16 MXU operands (v5e/v6e/v7x), f32 accumulation, in-kernel x cast.
    out_bf16 = jax.block_until_ready(
        mlp_forward(params, x_big, block_batch=256, use_bf16=True)
    )
    assert out_bf16.shape == (1024, dims[-1])
    assert jnp.allclose(out_bf16, ref_big, atol=5e-2, rtol=5e-2), "bf16 path mismatch"

    # 4) Natural-layout (non-lane-dense) path still works.
    out_plain = jax.block_until_ready(
        mlp_forward(params, x_big, block_batch=256, lane_dense=False)
    )
    assert jnp.allclose(out_plain, ref_big, atol=1e-4, rtol=1e-4), "plain-layout mismatch"

    print("KERNEL_OK")
</pallas_src>

<mosaic_0001>
module attributes {stable_mosaic.version = 11 : i64} {
  func.func @_mlp_kernel(%arg0: i32, %arg1: memref<8x32xf32, #tpu.memory_space<vmem>>, %arg2: memref<32x64xf32, #tpu.memory_space<vmem>>, %arg3: memref<1x64xf32, #tpu.memory_space<vmem>>, %arg4: memref<64x16xf32, #tpu.memory_space<vmem>>, %arg5: memref<1x16xf32, #tpu.memory_space<vmem>>, %arg6: memref<1x128xf32, #tpu.memory_space<vmem>>) attributes {dimension_semantics = [#tpu.dimension_semantics<parallel>], iteration_bounds = array<i64: 1>, scalar_prefetch = 0 : i64, scratch_operands = 0 : i64, tpu.core_type = #tpu.core_type<tc>, window_params = [{transform_indices = @transform_0, window_bounds = array<i64: 8, 32>}, {pipeline_mode = #tpu.pipeline_mode<synchronous>, transform_indices = @transform_1, window_bounds = array<i64: 32, 64>}, {pipeline_mode = #tpu.pipeline_mode<synchronous>, transform_indices = @transform_2, window_bounds = array<i64: 1, 64>}, {pipeline_mode = #tpu.pipeline_mode<synchronous>, transform_indices = @transform_3, window_bounds = array<i64: 64, 16>}, {pipeline_mode = #tpu.pipeline_mode<synchronous>, transform_indices = @transform_4, window_bounds = array<i64: 1, 16>}, {transform_indices = @transform_5, window_bounds = array<i64: 1, 128>}]} {
    %c0 = arith.constant 0 : index
    %c0_0 = arith.constant 0 : index
    %0 = vector.load %arg1[%c0, %c0_0] : memref<8x32xf32, #tpu.memory_space<vmem>>, vector<8x32xf32>
    %c0_1 = arith.constant 0 : index
    %c0_2 = arith.constant 0 : index
    %1 = vector.load %arg2[%c0_1, %c0_2] : memref<32x64xf32, #tpu.memory_space<vmem>>, vector<32x64xf32>
    %c0_3 = arith.constant 0 : index
    %c0_4 = arith.constant 0 : index
    %2 = vector.load %arg3[%c0_3, %c0_4] : memref<1x64xf32, #tpu.memory_space<vmem>>, vector<1x64xf32>
    %cst = arith.constant dense<0.000000e+00> : vector<8x64xf32>
    %3 = tpu.matmul %0, %1, %cst {dimension_numbers = #tpu.dot_dimension_numbers<[1], [0], [0], [1], [0, 0, 1, 1], [], []>} : vector<8x32xf32>, vector<32x64xf32>, vector<8x64xf32> -> vector<8x64xf32>
    %4 = vector.broadcast %2 : vector<1x64xf32> to vector<8x64xf32>
    %5 = arith.addf %3, %4 : vector<8x64xf32>
    %cst_5 = arith.constant 0.000000e+00 : f32
    %6 = vector.broadcast %cst_5 : f32 to vector<8x64xf32>
    %7 = arith.maximumf %5, %6 : vector<8x64xf32>
    %c0_6 = arith.constant 0 : index
    %c0_7 = arith.constant 0 : index
    %8 = vector.load %arg4[%c0_6, %c0_7] : memref<64x16xf32, #tpu.memory_space<vmem>>, vector<64x16xf32>
    %c0_8 = arith.constant 0 : index
    %c0_9 = arith.constant 0 : index
    %9 = vector.load %arg5[%c0_8, %c0_9] : memref<1x16xf32, #tpu.memory_space<vmem>>, vector<1x16xf32>
    %cst_10 = arith.constant dense<0.000000e+00> : vector<8x16xf32>
    %10 = tpu.matmul %7, %8, %cst_10 {dimension_numbers = #tpu.dot_dimension_numbers<[1], [0], [0], [1], [0, 0, 1, 1], [], []>} : vector<8x64xf32>, vector<64x16xf32>, vector<8x16xf32> -> vector<8x16xf32>
    %11 = vector.broadcast %9 : vector<1x16xf32> to vector<8x16xf32>
    %12 = arith.addf %10, %11 : vector<8x16xf32>
    %13 = vector.shape_cast %12 : vector<8x16xf32> to vector<1x128xf32>
    %c0_11 = arith.constant 0 : index
    %c0_12 = arith.constant 0 : index
    %14 = vector.load %arg6[%c0_11, %c0_12] : memref<1x128xf32, #tpu.memory_space<vmem>>, vector<1x128xf32>
    tpu.vector_store %arg6[%c0_11, %c0_12], %13 {strides = array<i32>} : memref<1x128xf32, #tpu.memory_space<vmem>>, vector<1x128xf32>,
    return
  }
  func.func @transform_0(%arg0: i32) -> (i32, i32) {
    %c0_i32 = arith.constant 0 : i32
    %c0_i32_0 = arith.constant 0 : i32
    return %arg0, %c0_i32 : i32, i32
  }
  func.func @transform_1(%arg0: i32) -> (i32, i32) {
    %c0_i32 = arith.constant 0 : i32
    %c0_i32_0 = arith.constant 0 : i32
    %c0_i32_1 = arith.constant 0 : i32
    return %c0_i32, %c0_i32_0 : i32, i32
  }
  func.func @transform_2(%arg0: i32) -> (i32, i32) {
    %c0_i32 = arith.constant 0 : i32
    %c0_i32_0 = arith.constant 0 : i32
    %c0_i32_1 = arith.constant 0 : i32
    return %c0_i32, %c0_i32_0 : i32, i32
  }
  func.func @transform_3(%arg0: i32) -> (i32, i32) {
    %c0_i32 = arith.constant 0 : i32
    %c0_i32_0 = arith.constant 0 : i32
    %c0_i32_1 = arith.constant 0 : i32
    return %c0_i32, %c0_i32_0 : i32, i32
  }
  func.func @transform_4(%arg0: i32) -> (i32, i32) {
    %c0_i32 = arith.constant 0 : i32
    %c0_i32_0 = arith.constant 0 : i32
    %c0_i32_1 = arith.constant 0 : i32
    return %c0_i32, %c0_i32_0 : i32, i32
  }
  func.func @transform_5(%arg0: i32) -> (i32, i32) {
    %c0_i32 = arith.constant 0 : i32
    %c0_i32_0 = arith.constant 0 : i32
    return %arg0, %c0_i32 : i32, i32
  }
}

module attributes {stable_mosaic.version = 11 : i64} {
  func.func @_mlp_kernel(%arg0: i32, %arg1: memref<8x32xf32, #tpu.memory_space<vmem>>, %arg2: memref<32x64xf32, #tpu.memory_space<vmem>>, %arg3: memref<1x64xf32, #tpu.memory_space<vmem>>, %arg4: memref<64x16xf32, #tpu.memory_space<vmem>>, %arg5: memref<1x16xf32, #tpu.memory_space<vmem>>, %arg6: memref<8x16xf32, #tpu.memory_space<vmem>>) attributes {dimension_semantics = [#tpu.dimension_semantics<parallel>], iteration_bounds = array<i64: 1>, scalar_prefetch = 0 : i64, scratch_operands = 0 : i64, tpu.core_type = #tpu.core_type<tc>, window_params = [{transform_indices = @transform_0, window_bounds = array<i64: 8, 32>}, {pipeline_mode = #tpu.pipeline_mode<synchronous>, transform_indices = @transform_1, window_bounds = array<i64: 32, 64>}, {pipeline_mode = #tpu.pipeline_mode<synchronous>, transform_indices = @transform_2, window_bounds = array<i64: 1, 64>}, {pipeline_mode = #tpu.pipeline_mode<synchronous>, transform_indices = @transform_3, window_bounds = array<i64: 64, 16>}, {pipeline_mode = #tpu.pipeline_mode<synchronous>, transform_indices = @transform_4, window_bounds = array<i64: 1, 16>}, {transform_indices = @transform_5, window_bounds = array<i64: 8, 16>}]} {
    %c0 = arith.constant 0 : index
    %c0_0 = arith.constant 0 : index
    %0 = vector.load %arg1[%c0, %c0_0] : memref<8x32xf32, #tpu.memory_space<vmem>>, vector<8x32xf32>
    %c0_1 = arith.constant 0 : index
    %c0_2 = arith.constant 0 : index
    %1 = vector.load %arg2[%c0_1, %c0_2] : memref<32x64xf32, #tpu.memory_space<vmem>>, vector<32x64xf32>
    %c0_3 = arith.constant 0 : index
    %c0_4 = arith.constant 0 : index
    %2 = vector.load %arg3[%c0_3, %c0_4] : memref<1x64xf32, #tpu.memory_space<vmem>>, vector<1x64xf32>
    %cst = arith.constant dense<0.000000e+00> : vector<8x64xf32>
    %3 = tpu.matmul %0, %1, %cst {dimension_numbers = #tpu.dot_dimension_numbers<[1], [0], [0], [1], [0, 0, 1, 1], [], []>} : vector<8x32xf32>, vector<32x64xf32>, vector<8x64xf32> -> vector<8x64xf32>
    %4 = vector.broadcast %2 : vector<1x64xf32> to vector<8x64xf32>
    %5 = arith.addf %3, %4 : vector<8x64xf32>
    %cst_5 = arith.constant 0.000000e+00 : f32
    %6 = vector.broadcast %cst_5 : f32 to vector<8x64xf32>
    %7 = arith.maximumf %5, %6 : vector<8x64xf32>
    %c0_6 = arith.constant 0 : index
    %c0_7 = arith.constant 0 : index
    %8 = vector.load %arg4[%c0_6, %c0_7] : memref<64x16xf32, #tpu.memory_space<vmem>>, vector<64x16xf32>
    %c0_8 = arith.constant 0 : index
    %c0_9 = arith.constant 0 : index
    %9 = vector.load %arg5[%c0_8, %c0_9] : memref<1x16xf32, #tpu.memory_space<vmem>>, vector<1x16xf32>
    %cst_10 = arith.constant dense<0.000000e+00> : vector<8x16xf32>
    %10 = tpu.matmul %7, %8, %cst_10 {dimension_numbers = #tpu.dot_dimension_numbers<[1], [0], [0], [1], [0, 0, 1, 1], [], []>} : vector<8x64xf32>, vector<64x16xf32>, vector<8x16xf32> -> vector<8x16xf32>
    %11 = vector.broadcast %9 : vector<1x16xf32> to vector<8x16xf32>
    %12 = arith.addf %10, %11 : vector<8x16xf32>
    %c0_11 = arith.constant 0 : index
    %c0_12 = arith.constant 0 : index
    %13 = vector.load %arg6[%c0_11, %c0_12] : memref<8x16xf32, #tpu.memory_space<vmem>>, vector<8x16xf32>
    tpu.vector_store %arg6[%c0_11, %c0_12], %12 {strides = array<i32>} : memref<8x16xf32, #tpu.memory_space<vmem>>, vector<8x16xf32>,
    return
  }
  func.func @transform_0(%arg0: i32) -> (i32, i32) {
    %c0_i32 = arith.constant 0 : i32
    %c0_i32_0 = arith.constant 0 : i32
    return %arg0, %c0_i32 : i32, i32
  }
  func.func @transform_1(%arg0: i32) -> (i32, i32) {
    %c0_i32 = arith.constant 0 : i32
    %c0_i32_0 = arith.constant 0 : i32
    %c0_i32_1 = arith.constant 0 : i32
    return %c0_i32, %c0_i32_0 : i32, i32
  }
  func.func @transform_2(%arg0: i32) -> (i32, i32) {
    %c0_i32 = arith.constant 0 : i32
    %c0_i32_0 = arith.constant 0 : i32
    %c0_i32_1 = arith.constant 0 : i32
    return %c0_i32, %c0_i32_0 : i32, i32
  }
  func.func @transform_3(%arg0: i32) -> (i32, i32) {
    %c0_i32 = arith.constant 0 : i32
    %c0_i32_0 = arith.constant 0 : i32
    %c0_i32_1 = arith.constant 0 : i32
    return %c0_i32, %c0_i32_0 : i32, i32
  }
  func.func @transform_4(%arg0: i32) -> (i32, i32) {
    %c0_i32 = arith.constant 0 : i32
    %c0_i32_0 = arith.constant 0 : i32
    %c0_i32_1 = arith.constant 0 : i32
    return %c0_i32, %c0_i32_0 : i32, i32
  }
  func.func @transform_5(%arg0: i32) -> (i32, i32) {
    %c0_i32 = arith.constant 0 : i32
    %c0_i32_0 = arith.constant 0 : i32
    return %arg0, %c0_i32 : i32, i32
  }
}

</mosaic_0001>

<bundles_post_ra>
// kernel: tpu_custom_call.1
= control target key start
LH: loop header
LB: loop body
LE: loop exit
PB: predicated region body
PF: predicated region fallthrough
CT: control target
= control target key end

     0   :  { %v307_v3 = vmov 0.0|0.0   ;;  %vm308_vm0 = vmmov 0   ;;  %v309_v6 = vmov 0.0   ;;  %s398_s0 = inlined_call_operand.vmem [shape: f32[8,32], index: 0, kind: input, shape index: {}]   ;;  %s399_s1 = inlined_call_operand.vmem [shape: f32[32,64], index: 1, kind: input, shape index: {}]   ;;  %s400_s2 = inlined_call_operand.vmem [shape: f32[1,64], index: 2, kind: input, shape index: {}]   ;;  %s401_s3 = inlined_call_operand.vmem [shape: f32[64,16], index: 3, kind: input, shape index: {}]   ;;  %s402_s4 = inlined_call_operand.vmem [shape: f32[1,16], index: 4, kind: input, shape index: {}]   ;;  %s403_s5 = inlined_call_operand.hbm [shape: f32[8,16], index: 5, kind: output, shape index: {}]  }
   0x1   :  { %v22_v0 = vld [vmem:[%s399_s1] sm:$0xff]  ;;  %v23_v1 = vld [vmem:[%s399_s1 + $0x8] sm:$0xff]  ;;  %v24_v2 = vld [vmem:[%s399_s1 + $0x10] sm:$0xff]  ;;  %261 = vmatprep.subr.bf16.mxu0 %v307_v3  ;;  %239 = vmatprep.mubr.msk.f32.mxu0 %vm308_vm0, %v309_v6 }
   0x2   :  { %v262_v4 = vpack.c.bf16 %v23_v1, %v22_v0  ;;  %v25_v5 = vld [vmem:[%s399_s1 + $0x18] sm:$0xff]  ;;  %v108_v7 = vld [vmem:[%s401_s3] sm:$0xff]  ;;  %267 = vmatprep.subr.bf16.mxu1 %v307_v3  ;;  %v109_v8 = vld [vmem:[%s401_s3 + $0x8] sm:$0xff]  ;;  %258 = vmatprep.mubr.msk.f32.mxu1 %vm308_vm0, %v309_v6 }
   0x3   :  { %v110_v9 = vld [vmem:[%s401_s3 + $0x10] sm:$0xff]  ;;  %v111_v10 = vld [vmem:[%s401_s3 + $0x18] sm:$0xff]  ;;  %v265_v11 = vpack.c.bf16 %v25_v5, %v24_v2  ;;  %v268_v12 = vpack.c.bf16 %v109_v8, %v108_v7 }
   0x4   :  { %263 = vmatpush3.bf16.msra.mxu0 %v262_v4 }
   0x5   :  { %264 = vmatprep.subr.bf16.mxu0 %v307_v3 }
   0x6   :  { %10 = vsyncpa [#allocation3], 0  ;;  %269 = vmatpush3.bf16.msra.mxu1 %v268_v12  ;;  %v271_v13 = vpack.c.bf16 %v111_v10, %v110_v9  ;;  %v112_v14 = vld [vmem:[%s401_s3 + $0x20] sm:$0xff]  ;;  %v113_v15 = vld [vmem:[%s401_s3 + $0x28] sm:$0xff]  ;;  %vm33_vm1 = vcmask 261120   ;;  %vm123_vm2 = vcmask 523264  }
   0x7   :  { %270 = vmatprep.subr.bf16.mxu1 %v307_v3  ;;  %v21_v16 = vld [vmem:[%s398_s0] sm:$0xff]  ;;  %v274_v17 = vpack.c.bf16 %v113_v15, %v112_v14  ;;  %v114_v18 = vld [vmem:[%s401_s3 + $0x30] sm:$0xff]  ;;  %v115_v19 = vld [vmem:[%s401_s3 + $0x38] sm:$0xff]  ;;  %s310_s21 = smov [#allocation2]   ;;  %vm197_vm3 = vcmask 130048  }
   0x8   :  { %266 = vmatpush3.bf16.msra.mxu0 %v265_v11  ;;  %v277_v20 = vpack.c.bf16 %v115_v19, %v114_v18  ;;  %v213_v21 = vld [vmem:[%s400_s2] ss:$0 sm:$0xff]  ;;  %s205_s22 = sshll.u32 %s310_s21, 4  ;;  %s206_s22 = int_to_ptr.vmem [resolvable:$true] %s205_s22 }
   0x9   :  { %v215_v26 = vld [vmem:[%s402_s4] ss:$0 sm:$0xff]  ;;  %s283_s3 = scalar_lea.vmem %s206_s22, 128  ;;  %p288_p1 = scmp.lt.s32.totalorder %s206_s22, %s206_s22 }
   0xa   :  { %272 = vmatpush3.bf16.msra.mxu1 %v271_v13  ;;  %p284_p0 = scmp.ne.s32.totalorder %s206_s22, %s283_s3  ;;  %p289_p2 = scmp.lt.s32.totalorder %s283_s3, %s283_s3 }
   0xb   :  { %240 = vmatmul.mubr.msk.f32.vlgmr.msra.gmra.mrb[0].mxu0 %vm33_vm1, %v21_v16  ;;  %273 = vmatprep.subr.bf16.mxu1 %v307_v3 }
   0xc   :  { %p290_p3 = por %p289_p2, %p288_p1 }
   0xe   :  { %275 = vmatpush3.bf16.msra.mxu1 %v274_v17  ;;  %p291_p4 = pnand %p290_p3, %p284_p0 }
   0xf   :  { %276 = vmatprep.subr.bf16.mxu1 %v307_v3 }
  0x12   :  { %278 = vmatpush3.bf16.msra.mxu1 %v277_v20 }
  0xde   :  { %v103_v22 = vpop.f32.mrb[0].mxu0 }
  0xdf   :  { %v104_v23 = vadd.f32 %v213_v21, %v103_v22  ;;  %v241_v24 = vpop.f32.mrb[1].mxu0 }
  0xe1   :  { %v107_v25 = vmax.f32 %v104_v23, 0.0 }
  0xe3   :  { %259 = vmatmul.mubr.msk.f32.vlgmr.msra.gmra.mrb[0].mxu1 %vm123_vm2, %v107_v25 }
 0x1b6   :  { %v193_v27 = vpop.f32.mrb[0].mxu1 }
 0x1b7   :  { %v194_v28 = vadd.f32 %v215_v26, %v193_v27  ;;  %v260_v29 = vpop.f32.mrb[1].mxu1 }
 0x1b9   :  { %198 = vst.msk [vmem:[#allocation2] sm:$0xff] %vm197_vm3, %v194_v28 }
 0x1ba   :  { %294 = shalt.err (!%p291_p4)
}
 0x1bb   :  { %s295_s24 = scalar_lea.hbm %s403_s5, 128 }
 0x1bc   :  { %p296_p5 = scmp.ne.s32.totalorder %s403_s5, %s295_s24  ;;  %p299_p6 = scmp.lt.u32.totalorder %s295_s24, %s403_s5 }
 0x1be   :  { %p301_p7 = pnand %p299_p6, %p296_p5 }
 0x1c0   :  { %304 = shalt.err (!%p301_p7)
}
 0x1c1   :  { %208 = dma.vmem_to_hbm [thread:$0]  %s206_s22, 128, %s403_s5, [#allocation3]  }
 0x1c2   :  { %305 = dma.done.wait [#allocation3], 128  }
 0x1c3   :  { %306 = vsyncadd [#allocation3], 4294967168 }
 0x1c4   :  { %212 = vsyncpa [#allocation3], 1 }

</bundles_post_ra>
